<compile_context>
chip_gen: v6e
topology: v6e:2x2x1
jax: 0.10.0
libtpu: 0.0.40
codegen_flags: <defaults>
</compile_context>

<pallas_src>
from functools import partial

import numpy as np
import jax
import jax.numpy as jnp
from jax.experimental import pallas as pl
from jax.experimental.pallas import tpu as pltpu


def _round_up(x, m):
    return ((x + m - 1) // m) * m


def _hw_defaults():
    """Pick (row_tile, vmem_limit_bytes) from the local TPU generation."""
    vmem = None
    try:
        info = pltpu.get_tpu_info()
        vmem = getattr(info, "vmem_capacity_bytes", None)
    except Exception:
        vmem = None
    if vmem is not None and vmem >= 96 * 1024 * 1024:
        # v5e / v6e: 128 MiB VMEM -> big row tile, raise the scoped limit.
        return 1024, 96 * 1024 * 1024
    # v7x (64 MiB per TC) or unknown: conservative settings safe everywhere.
    return 512, 52 * 1024 * 1024


def _mlp_kernel(tile_idx_ref, x_ref, wgu_ref, wd_ref, o_ref, acc_ref, *, tf):
    # tile_idx_ref is the scalar-prefetch array; it is only consumed by the
    # index_maps (active-ff-tile skipping), not by the body.
    del tile_idx_ref
    j = pl.program_id(1)

    @pl.when(j == 0)
    def _():
        acc_ref[...] = jnp.zeros_like(acc_ref)

    # x kept in its native dtype for the DMA; cast to the MXU dtype here.
    x = x_ref[...].astype(wgu_ref.dtype)                       # (tm, Dp)

    # One fused gate|up matmul: wgu block is [gate tile j | up tile j].
    gu = jnp.dot(x, wgu_ref[...], preferred_element_type=jnp.float32)  # (tm, 2*tf)
    g = gu[:, :tf]                                              # lane-aligned slice
    u = gu[:, tf:]

    # silu(g) = g * sigmoid(g); exact reciprocal (EUP has slack).
    silu_g = g * pl.reciprocal(1.0 + jnp.exp(-g), approx=False)
    h = silu_g * u                                              # mask is folded into wd

    acc_ref[...] += jnp.dot(h.astype(wd_ref.dtype), wd_ref[...],
                            preferred_element_type=jnp.float32)

    @pl.when(j == pl.num_programs(1) - 1)
    def _():
        o_ref[...] = acc_ref[...].astype(o_ref.dtype)


def prepare_llama_sparse_mlp(gate_w, up_w, down_w, mask, *, ff_tile=256,
                             compute_dtype=None):
    """One-time weight layout.

    gate_w/up_w: [F, D] (torch Linear layout), down_w: [D, F], mask: [F]
    (concrete array).  Returns a dict of kernel-ready operands; re-run after
    any mask update.
    """
    F, D = gate_w.shape
    assert up_w.shape == (F, D) and down_w.shape == (D, F) and mask.shape == (F,)

    if compute_dtype is None:
        # f32 models run the MXU in bf16 (f32 accumulation) — the fast path on
        # every TPU generation; bf16/f8 models keep their native dtype.
        compute_dtype = jnp.bfloat16 if gate_w.dtype == jnp.dtype(jnp.float32) \
            else gate_w.dtype

    tf = _round_up(min(ff_tile, _round_up(F, 128)), 128)
    Fp = _round_up(F, tf)
    Dp = _round_up(D, 128)
    n_tiles = Fp // tf

    # Active ff tiles (host-side; mask must be concrete).  Fully-pruned tiles
    # are never visited by the kernel grid.
    mask_np = np.zeros((Fp,), np.float32)
    mask_np[:F] = np.asarray(jax.device_get(mask)).astype(np.float32)
    tile_active = (mask_np.reshape(n_tiles, tf) != 0.0).any(axis=1)
    active_tiles = np.nonzero(tile_active)[0].astype(np.int32)

    # Gate/up transposed, padded, cast, and tile-interleaved into one operand:
    # column block j (width 2*tf) = [gate tile j | up tile j].
    wg_t = jnp.pad(gate_w.T, ((0, Dp - D), (0, Fp - F))).astype(compute_dtype)
    wu_t = jnp.pad(up_w.T, ((0, Dp - D), (0, Fp - F))).astype(compute_dtype)
    wgu = jnp.concatenate(
        [wg_t.reshape(Dp, n_tiles, tf), wu_t.reshape(Dp, n_tiles, tf)],
        axis=-1).reshape(Dp, n_tiles * 2 * tf)

    # Fold the 0/1 mask into the down-proj rows (exact for a binary mask),
    # removing the mask operand and per-step multiply from the kernel.
    wd_masked = mask[:, None].astype(down_w.dtype) * down_w.T          # (F, D)
    wd_masked = jnp.pad(wd_masked, ((0, Fp - F), (0, Dp - D))).astype(compute_dtype)

    return dict(
        wgu=wgu,
        wd=wd_masked,
        active_tiles=jnp.asarray(active_tiles),
        n_active=int(active_tiles.shape[0]),
        tf=tf, D=D, Dp=Dp,
        compute_dtype=compute_dtype,
    )


def llama_sparse_mlp_forward(x, prep, *, row_tile=None, vmem_limit_bytes=None):
    """Training-mode LlamaSparseMLP forward using prepared weights."""
    orig_shape = x.shape
    D = orig_shape[-1]
    assert D == prep["D"], "hidden dim mismatch with prepared weights"
    out_dtype = x.dtype

    x2 = x.reshape(-1, D)
    R = x2.shape[0]

    if prep["n_active"] == 0:
        # Every intermediate feature is pruned -> output is exactly zero.
        return jnp.zeros(orig_shape, out_dtype)

    Dp, tf = prep["Dp"], prep["tf"]

    hw_tm, hw_vmem = _hw_defaults()
    if row_tile is None:
        row_tile = hw_tm
    if vmem_limit_bytes is None:
        vmem_limit_bytes = hw_vmem

    # Row (sublane) granularity from the activation dtype; zero padding of
    # rows/D is exact (padded rows are independent and sliced off below).
    sub = max(8, 32 // jnp.dtype(x.dtype).itemsize)
    tm = min(row_tile, _round_up(R, sub))
    Rp = _round_up(R, tm)
    if Rp != R or Dp != D:
        x2 = jnp.pad(x2, ((0, Rp - R), (0, Dp - D)))

    grid = (Rp // tm, prep["n_active"])
    kernel = partial(_mlp_kernel, tf=tf)

    out = pl.pallas_call(
        kernel,
        out_shape=jax.ShapeDtypeStruct((Rp, Dp), out_dtype),
        grid_spec=pltpu.PrefetchScalarGridSpec(
            num_scalar_prefetch=1,
            grid=grid,
            in_specs=[
                pl.BlockSpec((tm, Dp), lambda i, j, idx: (i, 0)),        # x rows
                pl.BlockSpec((Dp, 2 * tf), lambda i, j, idx: (0, idx[j])),  # [gate|up] tile
                pl.BlockSpec((tf, Dp), lambda i, j, idx: (idx[j], 0)),   # masked down tile
            ],
            out_specs=pl.BlockSpec((tm, Dp), lambda i, j, idx: (i, 0)),
            scratch_shapes=[pltpu.VMEM((tm, Dp), jnp.float32)],
        ),
        compiler_params=pltpu.CompilerParams(
            dimension_semantics=("parallel", "arbitrary"),
            vmem_limit_bytes=vmem_limit_bytes,
        ),
    )(prep["active_tiles"], x2, prep["wgu"], prep["wd"])

    return out[:R, :D].reshape(orig_shape)


def llama_sparse_mlp(x, gate_w, up_w, down_w, mask, **kwargs):
    """Convenience one-shot wrapper (prefer persisting prepare_* across calls)."""
    prep = prepare_llama_sparse_mlp(gate_w, up_w, down_w, mask,
                                    ff_tile=kwargs.pop("ff_tile", 256))
    return llama_sparse_mlp_forward(x, prep, **kwargs)


def _reference(x, gate_w, up_w, down_w, mask, compute_dtype=jnp.float32):
    # Pure-JAX mirror of the torch training-mode forward, optionally at the
    # kernel's MXU compute precision (f32 accumulation).
    xc = x.astype(compute_dtype)
    g = jnp.dot(xc, gate_w.astype(compute_dtype).T,
                preferred_element_type=jnp.float32)
    u = jnp.dot(xc, up_w.astype(compute_dtype).T,
                preferred_element_type=jnp.float32)
    h = jax.nn.silu(g) * u * mask
    out = jnp.dot(h.astype(compute_dtype), down_w.astype(compute_dtype).T,
                  preferred_element_type=jnp.float32)
    return out.astype(x.dtype)


if __name__ == "__main__":
    B, S, D, F = 2, 8, 128, 256     # batch, seq, hidden, intermediate
    ff_tile = 128                   # two ff tiles -> exercises active-tile skipping

    key = jax.random.PRNGKey(0)
    kx, kg, ku, kd, km = jax.random.split(key, 5)

    x = jax.random.normal(kx, (B, S, D), dtype=jnp.float32)
    gate_w = jax.random.normal(kg, (F, D), dtype=jnp.float32) / jnp.sqrt(D)
    up_w = jax.random.normal(ku, (F, D), dtype=jnp.float32) / jnp.sqrt(D)
    down_w = jax.random.normal(kd, (D, F), dtype=jnp.float32) / jnp.sqrt(F)

    # Binary feature mask: some features pruned inside the first ff tile, the
    # whole second ff tile pruned (so one grid tile is skipped entirely).
    mask_first = (jax.random.uniform(km, (F // 2,)) > 0.25).astype(jnp.float32)
    mask = jnp.concatenate([mask_first, jnp.zeros((F // 2,), jnp.float32)])

    prep = prepare_llama_sparse_mlp(gate_w, up_w, down_w, mask, ff_tile=ff_tile)
    assert prep["n_active"] == 1, "expected the fully-masked ff tile to be skipped"

    out = llama_sparse_mlp_forward(x, prep)
    out = jax.block_until_ready(out)

    # Reference at the kernel's MXU precision (bf16 matmul, f32 accumulation).
    ref_mxu = _reference(x, gate_w, up_w, down_w, mask,
                         compute_dtype=prep["compute_dtype"])
    # Pure-f32 reference for a coarse sanity bound.
    ref_f32 = _reference(x, gate_w, up_w, down_w, mask, compute_dtype=jnp.float32)

    assert out.shape == ref_f32.shape and out.dtype == ref_f32.dtype
    assert jnp.allclose(out, ref_mxu, atol=2e-2, rtol=2e-2), (
        "mismatch vs MXU-precision reference: max abs err "
        f"{float(jnp.max(jnp.abs(out - ref_mxu)))}")
    assert jnp.allclose(out, ref_f32, atol=1e-1, rtol=1e-1), (
        "mismatch vs f32 reference: max abs err "
        f"{float(jnp.max(jnp.abs(out - ref_f32)))}")

    print("KERNEL_OK")
</pallas_src>

<mosaic_0001>
module attributes {stable_mosaic.version = 11 : i64} {
  func.func @_mlp_kernel(%arg0: i32, %arg1: i32, %arg2: memref<1xi32, #tpu.memory_space<smem>>, %arg3: memref<16x128xf32, #tpu.memory_space<vmem>>, %arg4: memref<128x256xbf16, #tpu.memory_space<vmem>>, %arg5: memref<128x128xbf16, #tpu.memory_space<vmem>>, %arg6: memref<16x128xf32, #tpu.memory_space<vmem>>, %arg7: memref<16x128xf32, #tpu.memory_space<vmem>>) attributes {dimension_semantics = [#tpu.dimension_semantics<parallel>, #tpu.dimension_semantics<arbitrary>], iteration_bounds = array<i64: 1, 1>, scalar_prefetch = 1 : i64, scratch_operands = 1 : i64, tpu.core_type = #tpu.core_type<tc>, window_params = [{transform_indices = @transform_0, window_bounds = array<i64: 16, 128>}, {transform_indices = @transform_1, window_bounds = array<i64: 128, 256>}, {transform_indices = @transform_2, window_bounds = array<i64: 128, 128>}, {transform_indices = @transform_3, window_bounds = array<i64: 16, 128>}]} {
    %c0_i32 = arith.constant 0 : i32
    %0 = arith.cmpi eq, %arg1, %c0_i32 : i32
    %1 = arith.extui %0 : i1 to i32
    %c0_i32_0 = arith.constant 0 : i32
    %2 = arith.cmpi ne, %1, %c0_i32_0 : i32
    scf.if %2 {
      %cst_15 = arith.constant 0.000000e+00 : f32
      %26 = vector.broadcast %cst_15 : f32 to vector<16x128xf32>
      %c0_16 = arith.constant 0 : index
      %c0_17 = arith.constant 0 : index
      %27 = vector.load %arg7[%c0_16, %c0_17] : memref<16x128xf32, #tpu.memory_space<vmem>>, vector<16x128xf32>
      tpu.vector_store %arg7[%c0_16, %c0_17], %26 {strides = array<i32>} : memref<16x128xf32, #tpu.memory_space<vmem>>, vector<16x128xf32>,
    } else {
    }
    %c0 = arith.constant 0 : index
    %c0_1 = arith.constant 0 : index
    %3 = vector.load %arg3[%c0, %c0_1] : memref<16x128xf32, #tpu.memory_space<vmem>>, vector<16x128xf32>
    %4 = arith.truncf %3 : vector<16x128xf32> to vector<16x128xbf16>
    %c0_2 = arith.constant 0 : index
    %c0_3 = arith.constant 0 : index
    %5 = vector.load %arg4[%c0_2, %c0_3] : memref<128x256xbf16, #tpu.memory_space<vmem>>, vector<128x256xbf16>
    %cst = arith.constant dense<0.000000e+00> : vector<16x256xf32>
    %6 = tpu.matmul %4, %5, %cst {dimension_numbers = #tpu.dot_dimension_numbers<[1], [0], [0], [1], [0, 0, 1, 1], [], []>} : vector<16x128xbf16>, vector<128x256xbf16>, vector<16x256xf32> -> vector<16x256xf32>
    %7 = vector.extract_strided_slice %6 {offsets = [0, 0], sizes = [16, 128], strides = [1, 1]} : vector<16x256xf32> to vector<16x128xf32>
    %8 = vector.extract_strided_slice %6 {offsets = [0, 128], sizes = [16, 128], strides = [1, 1]} : vector<16x256xf32> to vector<16x128xf32>
    %cst_4 = arith.constant 0.000000e+00 : f32
    %9 = vector.broadcast %cst_4 : f32 to vector<16x128xf32>
    %10 = arith.subf %9, %7 : vector<16x128xf32>
    %11 = math.exp %10 : vector<16x128xf32>
    %cst_5 = arith.constant 1.000000e+00 : f32
    %12 = vector.broadcast %cst_5 : f32 to vector<16x128xf32>
    %13 = arith.addf %12, %11 : vector<16x128xf32>
    %14 = tpu.reciprocal %13 : vector<16x128xf32> -> vector<16x128xf32>
    %15 = arith.mulf %7, %14 : vector<16x128xf32>
    %16 = arith.mulf %15, %8 : vector<16x128xf32>
    %c0_6 = arith.constant 0 : index
    %c0_7 = arith.constant 0 : index
    %17 = vector.load %arg7[%c0_6, %c0_7] : memref<16x128xf32, #tpu.memory_space<vmem>>, vector<16x128xf32>
    %18 = arith.truncf %16 : vector<16x128xf32> to vector<16x128xbf16>
    %c0_8 = arith.constant 0 : index
    %c0_9 = arith.constant 0 : index
    %19 = vector.load %arg5[%c0_8, %c0_9] : memref<128x128xbf16, #tpu.memory_space<vmem>>, vector<128x128xbf16>
    %cst_10 = arith.constant dense<0.000000e+00> : vector<16x128xf32>
    %20 = tpu.matmul %18, %19, %cst_10 {dimension_numbers = #tpu.dot_dimension_numbers<[1], [0], [0], [1], [0, 0, 1, 1], [], []>} : vector<16x128xbf16>, vector<128x128xbf16>, vector<16x128xf32> -> vector<16x128xf32>
    %21 = arith.addf %17, %20 : vector<16x128xf32>
    %c0_11 = arith.constant 0 : index
    %c0_12 = arith.constant 0 : index
    %22 = vector.load %arg7[%c0_11, %c0_12] : memref<16x128xf32, #tpu.memory_space<vmem>>, vector<16x128xf32>
    tpu.vector_store %arg7[%c0_11, %c0_12], %21 {strides = array<i32>} : memref<16x128xf32, #tpu.memory_space<vmem>>, vector<16x128xf32>,
    %c0_i32_13 = arith.constant 0 : i32
    %23 = arith.cmpi eq, %arg1, %c0_i32_13 : i32
    %24 = arith.extui %23 : i1 to i32
    %c0_i32_14 = arith.constant 0 : i32
    %25 = arith.cmpi ne, %24, %c0_i32_14 : i32
    scf.if %25 {
      %c0_15 = arith.constant 0 : index
      %c0_16 = arith.constant 0 : index
      %26 = vector.load %arg7[%c0_15, %c0_16] : memref<16x128xf32, #tpu.memory_space<vmem>>, vector<16x128xf32>
      %c0_17 = arith.constant 0 : index
      %c0_18 = arith.constant 0 : index
      %27 = vector.load %arg6[%c0_17, %c0_18] : memref<16x128xf32, #tpu.memory_space<vmem>>, vector<16x128xf32>
      tpu.vector_store %arg6[%c0_17, %c0_18], %26 {strides = array<i32>} : memref<16x128xf32, #tpu.memory_space<vmem>>, vector<16x128xf32>,
    } else {
    }
    return
  }
  func.func @transform_0(%arg0: i32, %arg1: i32, %arg2: memref<1xi32, #tpu.memory_space<smem>>) -> (i32, i32) {
    %c0_i32 = arith.constant 0 : i32
    %c0_i32_0 = arith.constant 0 : i32
    return %arg0, %c0_i32 : i32, i32
  }
  func.func @transform_1(%arg0: i32, %arg1: i32, %arg2: memref<1xi32, #tpu.memory_space<smem>>) -> (i32, i32) {
    %0 = arith.index_cast %arg1 : i32 to index
    %1 = memref.load %arg2[%0] : memref<1xi32, #tpu.memory_space<smem>>
    %c0_i32 = arith.constant 0 : i32
    %c0_i32_0 = arith.constant 0 : i32
    return %c0_i32, %1 : i32, i32
  }
  func.func @transform_2(%arg0: i32, %arg1: i32, %arg2: memref<1xi32, #tpu.memory_space<smem>>) -> (i32, i32) {
    %0 = arith.index_cast %arg1 : i32 to index
    %1 = memref.load %arg2[%0] : memref<1xi32, #tpu.memory_space<smem>>
    %c0_i32 = arith.constant 0 : i32
    %c0_i32_0 = arith.constant 0 : i32
    return %1, %c0_i32 : i32, i32
  }
  func.func @transform_3(%arg0: i32, %arg1: i32, %arg2: memref<1xi32, #tpu.memory_space<smem>>) -> (i32, i32) {
    %c0_i32 = arith.constant 0 : i32
    %c0_i32_0 = arith.constant 0 : i32
    return %arg0, %c0_i32 : i32, i32
  }
}

</mosaic_0001>

<bundles_post_ra>
// kernel: tpu_custom_call.1
= control target key start
LH: loop header
LB: loop body
LE: loop exit
PB: predicated region body
PF: predicated region fallthrough
CT: control target
= control target key end

     0   :  { %10 = vsyncpa [#allocation6], 0  ;;  %s656_s0 = inlined_call_operand.<no memory space> [shape: s32[1], index: 0, kind: input, shape index: {}]   ;;  %s657_s1 = inlined_call_operand.hbm [shape: f32[16,128], index: 1, kind: input, shape index: {}]   ;;  %s658_s2 = inlined_call_operand.hbm [shape: bf16[128,512], index: 2, kind: input, shape index: {}]   ;;  %s659_s3 = inlined_call_operand.hbm [shape: bf16[256,128], index: 3, kind: input, shape index: {}]   ;;  %s660_s4 = inlined_call_operand.hbm [shape: f32[16,128], index: 4, kind: output, shape index: {}]  }
   0x1   :  { %11 = vsyncpa [#allocation9], 0 }
   0x2   :  { %12 = vsyncpa [#allocation7], 0  ;;  %s402_s17 = sshll.u32 %s656_s0, 7  ;;  %s575_s21 = smov [#allocation8]  }
   0x3   :  { %s33_s20 = scalar_lea.hbm %s658_s2, %s402_s17  ;;  %s34_s22 = sshll.u32 %s575_s21, 4  ;;  %s35_s22 = int_to_ptr.vmem [resolvable:$true] %s34_s22 }
   0x4   :  { %s485_s23 = scalar_lea.hbm %s33_s20, 2048  ;;  %s487_s26 = scalar_lea.hbm %s658_s2, 4096 }
   0x5   :  { %p486_p0 = scmp.ne.s32.totalorder %s33_s20, %s485_s23  ;;  %p488_p1 = scmp.lt.s32.totalorder %s33_s20, %s658_s2 }
   0x6   :  { %p489_p2 = scmp.lt.s32.totalorder %s487_s26, %s485_s23 }
   0x8   :  { %p490_p3 = por %p489_p2, %p488_p1 }
   0xa   :  { %p491_p4 = pnand %p490_p3, %p486_p0 }
   0xc   :  { %494 = shalt.err (!%p491_p4)
}
   0xd   :  { %s495_s29 = scalar_lea.vmem %s35_s22, 2048  ;;  %p500_p6 = scmp.lt.s32.totalorder %s35_s22, %s35_s22 }
   0xe   :  { %p496_p5 = scmp.ne.s32.totalorder %s35_s22, %s495_s29  ;;  %p501_p7 = scmp.lt.s32.totalorder %s495_s29, %s495_s29 }
  0x10   :  { %p502_p8 = por %p501_p7, %p500_p6 }
  0x12   :  { %p503_p9 = pnand %p502_p8, %p496_p5 }
  0x14   :  { %506 = shalt.err (!%p503_p9)
}
  0x15   :  { %s576_s30 = smov 256   ;;  %s577_s5 = smov 128  }
  0x16   :  { %s578_s6 = smov 8   ;;  %s403_s2 = sshll.u32 %s656_s0, 10 }
  0x17   :  { %40 = dma.hbm_to_vmem [thread:$0]  %s33_s20, 2048, %s35_s22, [#allocation9], %s576_s30, %s577_s5, %s578_s6  }
  0x18   :  { %s579_s9 = smov [#allocation5]   ;;  %s632_s13 = scalar_lea.hbm %s659_s3, %s403_s2 }
  0x19   :  { %s18_s10 = sshll.u32 %s579_s9, 4  ;;  %s19_s10 = int_to_ptr.vmem [resolvable:$true] %s18_s10 }
  0x1a   :  { %s515_s14 = scalar_lea.vmem %s19_s10, 256  ;;  %p520_p11 = scmp.lt.s32.totalorder %s19_s10, %s19_s10 }
  0x1b   :  { %p516_p10 = scmp.ne.s32.totalorder %s19_s10, %s515_s14  ;;  %p521_p12 = scmp.lt.s32.totalorder %s515_s14, %s515_s14 }
  0x1d   :  { %p522_p13 = por %p521_p12, %p520_p11 }
  0x1f   :  { %p523_p0 = pnand %p522_p13, %p516_p10 }
  0x21   :  { %526 = shalt.err (!%p523_p0)
}
  0x22   :  { %24 = dma.hbm_to_vmem [thread:$0]  %s657_s1, 256, %s19_s10, [#allocation6], %s577_s5, %s577_s5, %s578_s6  }
  0x23   :  { %s580_s16 = smov [#allocation10]   ;;  %s527_s18 = scalar_lea.hbm %s632_s13, 1024 }
  0x24   :  { %s50_s17 = sshll.u32 %s580_s16, 4  ;;  %p528_p1 = scmp.ne.s32.totalorder %s632_s13, %s527_s18  ;;  %s51_s17 = int_to_ptr.vmem [resolvable:$true] %s50_s17 }
  0x25   :  { %s529_s21 = scalar_lea.hbm %s659_s3, 2048  ;;  %p530_p2 = scmp.lt.s32.totalorder %s632_s13, %s659_s3 }
  0x26   :  { %p531_p3 = scmp.lt.s32.totalorder %s529_s21, %s527_s18 }
  0x28   :  { %p532_p4 = por %p531_p3, %p530_p2 }
  0x2a   :  { %p533_p5 = pnand %p532_p4, %p528_p1 }
  0x2c   :  { %536 = shalt.err (!%p533_p5)
}
  0x2d   :  { %s537_s24 = scalar_lea.vmem %s51_s17, 1024  ;;  %p542_p7 = scmp.lt.s32.totalorder %s51_s17, %s51_s17 }
  0x2e   :  { %p538_p6 = scmp.ne.s32.totalorder %s51_s17, %s537_s24  ;;  %p543_p8 = scmp.lt.s32.totalorder %s537_s24, %s537_s24 }
  0x30   :  { %p544_p9 = por %p543_p8, %p542_p7 }
  0x32   :  { %p545_p10 = pnand %p544_p9, %p538_p6 }
  0x34   :  { %548 = shalt.err (!%p545_p10)
}
  0x35   :  { %s581_s1 = smov 64   ;;  %s582_s25 = smov 4  }
  0x36   :  { %56 = dma.hbm_to_vmem [thread:$0]  %s632_s13, 1024, %s51_s17, [#allocation9], %s581_s1, %s581_s1, %s582_s25  }
  0x37   :  { %569 = dma.done.wait [#allocation6], 256  }
  0x38   :  { %570 = vsyncadd [#allocation6], 4294967040 }
  0x39   :  { %571 = dma.done.wait [#allocation9], 3072  }
  0x3a   :  { %572 = vsyncadd [#allocation9], 4294964224  ;;  %v583_v0 = vmov 0   ;;  %v445_v1 = vld [vmem:[#allocation8 + $0x74] ss:$8 sps:$4 sm:$0xff]   ;;  %v584_v21 = vmov 0.0  }
  0x3b   :  { %208 = vmatprep.mubr.bf16.mxu0 %v583_v0  ;;  %v447_v2 = vld [vmem:[#allocation8 + $0x70] ss:$8 sps:$4 sm:$0xff]   ;;  %176 = vmatprep.subr.bf16.mxu0 %v445_v1  ;;  %v448_v3 = vld [vmem:[#allocation8 + $0x64] ss:$8 sps:$4 sm:$0xff]   ;;  %v450_v4 = vld [vmem:[#allocation8 + $0x60] ss:$8 sps:$4 sm:$0xff]  }
  0x3c   :  { %177 = vmatpush1.bf16.msra.mxu0 %v447_v2  ;;  %v451_v5 = vld [vmem:[#allocation8 + $0x54] ss:$8 sps:$4 sm:$0xff]   ;;  %v453_v6 = vld [vmem:[#allocation8 + $0x50] ss:$8 sps:$4 sm:$0xff]   ;;  %v454_v7 = vld [vmem:[#allocation8 + $0x44] ss:$8 sps:$4 sm:$0xff]   ;;  %413 = vmatprep.subr.bf16.mxu1 %v584_v21 }
  0x3d   :  { %178 = vmatprep.subr.bf16.mxu0 %v448_v3  ;;  %v456_v8 = vld [vmem:[#allocation8 + $0x40] ss:$8 sps:$4 sm:$0xff]   ;;  %v457_v9 = vld [vmem:[#allocation8 + $0x34] ss:$8 sps:$4 sm:$0xff]   ;;  %v459_v10 = vld [vmem:[#allocation8 + $0x30] ss:$8 sps:$4 sm:$0xff]  }
  0x3e   :  { %v460_v11 = vld [vmem:[#allocation8 + $0x24] ss:$8 sps:$4 sm:$0xff]   ;;  %v462_v12 = vld [vmem:[#allocation8 + $0x20] ss:$8 sps:$4 sm:$0xff]   ;;  %v463_v13 = vld [vmem:[#allocation8 + $0x14] ss:$8 sps:$4 sm:$0xff]  }
  0x3f   :  { %v465_v14 = vld [vmem:[#allocation8 + $0x10] ss:$8 sps:$4 sm:$0xff]   ;;  %v466_v15 = vld [vmem:[#allocation8 + $0x4] ss:$8 sps:$4 sm:$0xff]   ;;  %v468_v16 = vld [vmem:[#allocation8] ss:$8 sps:$4 sm:$0xff]  }
  0x40   :  { %179 = vmatpush1.bf16.msra.mxu0 %v450_v4  ;;  %v77_v17 = vld [vmem:[#allocation5] sm:$0xff]  ;;  %v78_v18 = vld [vmem:[#allocation5 + $0x8] sm:$0xff]  ;;  %v471_v23 = vld [vmem:[#allocation10 + $0x28] sm:$0xff]   ;;  %vm585_vm0 = vmmov 0   ;;  %s586_s3 = smov [#allocation11]  }
  0x41   :  { %180 = vmatprep.subr.bf16.mxu0 %v451_v5  ;;  %v79_v19 = vpack.c.bf16 %v78_v18, %v77_v17  ;;  %v469_v20 = vld [vmem:[#allocation10 + $0x38] sm:$0xff]   ;;  %v470_v22 = vld [vmem:[#allocation10 + $0x30] sm:$0xff]   ;;  %v472_v24 = vld [vmem:[#allocation10 + $0x20] sm:$0xff]   ;;  %429 = vmatprep.mubr.msk.bf16.mxu1 %vm585_vm0, %v584_v21  ;;  %s357_s26 = sshll.u32 %s586_s3, 4  ;;  %s358_s26 = int_to_ptr.vmem [resolvable:$true] %s357_s26 }
  0x42   :  { %414 = vmatpush3.bf16.msra.mxu1 %v469_v20  ;;  %v473_v25 = vld [vmem:[#allocation10 + $0x18] sm:$0xff]   ;;  %v474_v26 = vld [vmem:[#allocation10 + $0x10] sm:$0xff]   ;;  %v475_v27 = vld [vmem:[#allocation10 + $0x8] sm:$0xff]   ;;  %s549_s27 = scalar_lea.vmem %s358_s26, 256  ;;  %p554_p12 = scmp.lt.s32.totalorder %s358_s26, %s358_s26 }
  0x43   :  { %415 = vmatprep.subr.bf16.mxu1 %v584_v21  ;;  %v476_v28 = vld [vmem:[#allocation10] sm:$0xff]   ;;  %p550_p11 = scmp.ne.s32.totalorder %s358_s26, %s549_s27  ;;  %p555_p13 = scmp.lt.s32.totalorder %s549_s27, %s549_s27 }
  0x44   :  { %181 = vmatpush1.bf16.msra.mxu0 %v453_v6 }
  0x45   :  { %182 = vmatprep.subr.bf16.mxu0 %v454_v7  ;;  %p556_p0 = por %p555_p13, %p554_p12 }
  0x46   :  { %416 = vmatpush3.bf16.msra.mxu1 %v470_v22 }
  0x47   :  { %417 = vmatprep.subr.bf16.mxu1 %v584_v21  ;;  %p557_p1 = pnand %p556_p0, %p550_p11 }
  0x48   :  { %183 = vmatpush1.bf16.msra.mxu0 %v456_v8 }
  0x49   :  { %184 = vmatprep.subr.bf16.mxu0 %v457_v9 }
  0x4a   :  { %418 = vmatpush3.bf16.msra.mxu1 %v471_v23 }
  0x4b   :  { %419 = vmatprep.subr.bf16.mxu1 %v584_v21 }
  0x4c   :  { %185 = vmatpush1.bf16.msra.mxu0 %v459_v10 }
  0x4d   :  { %186 = vmatprep.subr.bf16.mxu0 %v460_v11 }
  0x4e   :  { %420 = vmatpush3.bf16.msra.mxu1 %v472_v24 }
  0x4f   :  { %421 = vmatprep.subr.bf16.mxu1 %v584_v21 }
  0x50   :  { %187 = vmatpush1.bf16.msra.mxu0 %v462_v12 }
  0x51   :  { %188 = vmatprep.subr.bf16.mxu0 %v463_v13 }
  0x52   :  { %422 = vmatpush3.bf16.msra.mxu1 %v473_v25 }
  0x53   :  { %423 = vmatprep.subr.bf16.mxu1 %v584_v21 }
  0x54   :  { %189 = vmatpush1.bf16.msra.mxu0 %v465_v14 }
  0x55   :  { %190 = vmatprep.subr.bf16.mxu0 %v466_v15 }
  0x56   :  { %424 = vmatpush3.bf16.msra.mxu1 %v474_v26 }
  0x57   :  { %425 = vmatprep.subr.bf16.mxu1 %v584_v21 }
  0x58   :  { %191 = vmatpush1.bf16.msra.mxu0 %v468_v16 }
  0x5a   :  { %426 = vmatpush3.bf16.msra.mxu1 %v475_v27 }
  0x5b   :  { %209 = vmatmul.mubr.bf16.vlgmr.msra.gmra.mxu0 %v79_v19  ;;  %427 = vmatprep.subr.bf16.mxu1 %v584_v21 }
  0x5e   :  { %428 = vmatpush3.bf16.msra.mxu1 %v476_v28 }
 0x11b   :  { %v210_v29 = vpop.f32.mrf.mxu0 }
 0x11c   :  { %v219_v30 = vsub.f32 0.0, %v210_v29 }
 0x11d   :  { %v212_v31 = vpop.f32.mrf.mxu0 }
 0x11e   :  { %v221_v32 = vmul.f32 1.442695, %v219_v30 }
 0x11f   :  { %v214_v33 = vpop.f32.mrf.mxu0 }
 0x120   :  { %477 = vpow2.f32 %v221_v32  ;;  %v220_v34 = vsub.f32 0.0, %v214_v33 }
 0x121   :  { %v216_v44 = vpop.f32.mrf.mxu0 }
 0x122   :  { %v223_v35 = vmul.f32 1.442695, %v220_v34 }
 0x124   :  { %479 = vpow2.f32 %v223_v35 }
 0x12d   :  { %v478_v36 = vpop.eup %477 }
 0x12e   :  { %v225_v37 = vadd.f32 1.0, %v478_v36 }
 0x130   :  { %481 = vrcp.f32 %v225_v37 }
 0x131   :  { %v480_v38 = vpop.eup %479 }
 0x132   :  { %v226_v39 = vadd.f32 1.0, %v480_v38 }
 0x134   :  { %483 = vrcp.f32 %v226_v39 }
 0x13d   :  { %v482_v40 = vpop.eup %481 }
 0x13e   :  { %v229_v41 = vmul.f32 %v482_v40, %v210_v29 }
 0x140   :  { %v231_v45 = vmul.f32 %v229_v41, %v212_v31 }
 0x141   :  { %v484_v42 = vpop.eup %483 }
 0x142   :  { %v230_v43 = vmul.f32 %v484_v42, %v214_v33 }
 0x144   :  { %v232_v46 = vmul.f32 %v230_v43, %v216_v44 }
 0x146   :  { %v235_v47 = vpack.c.bf16 %v232_v46, %v231_v45 }
 0x148   :  { %430 = vmatmul.mubr.bf16.vlgmr.msra.gmra.mxu1 %v235_v47 }
 0x208   :  { %v334_v48 = vpop.f32.mrf.mxu1 }
 0x209   :  { %350 = vst [vmem:[#allocation11] sm:$0xff] %v334_v48 }
 0x20a   :  { %v431_v49 = vpop.f32.mrf.mxu1 }
 0x20c   :  { %v337_v50 = vpop.f32.mrf.mxu1 }
 0x20d   :  { %351 = vst [vmem:[#allocation11 + $0x8] sm:$0xff] %v337_v50 }
 0x20e   :  { %v432_v51 = vpop.f32.mrf.mxu1 }
 0x20f   :  { %560 = shalt.err (!%p557_p1)
}
 0x210   :  { %363 = dma.vmem_to_hbm [thread:$0]  %s358_s26, 256, %s660_s4, [#allocation7], %s577_s5, %s577_s5, %s578_s6  }
 0x211   :  { %573 = dma.done.wait [#allocation7], 256  }
 0x212   :  { %574 = vsyncadd [#allocation7], 4294967040 }
 0x213   :  { %367 = vsyncpa [#allocation6], 1 }
 0x214   :  { %368 = vsyncpa [#allocation9], 1 }
 0x215   :  { %369 = vsyncpa [#allocation7], 1 }

</bundles_post_ra>
